<compile_context>
chip_gen: v6e
topology: v6e:2x2x1
jax: 0.10.0
libtpu: 0.0.40
codegen_flags: <defaults>
</compile_context>

<pallas_src>
import jax
import jax.numpy as jnp
from jax.experimental import pallas as pl
from jax.experimental.pallas import tpu as pltpu

# small synthetic shapes
B, S, H = 2, 8, 32          # batch, seq, hidden_size
KD, VD, F = 32, 32, 64      # total_key_depth, total_value_depth, filter_size
NH = 4                      # num_heads
DH = KD // NH               # head dim
EPS = 1e-6


def encoder_layer_kernel(x_ref, ln_ref, wqkv_ref, wo_ref, c1w_ref, c2w_ref,
                         cb_ref, o_ref):
    x = x_ref[...]                                   # (S, H) — one sequence

    ln = ln_ref[...]                                 # (4, H)
    g1, b1 = ln[0:1, :], ln[1:2, :]
    g2, b2 = ln[2:3, :], ln[3:4, :]
    cb = cb_ref[...]                                 # (1, F + H)
    c1b, c2b = cb[:, :F], cb[:, F:]

    def layer_norm(v, g, b):
        # torch custom LayerNorm: gamma * (x - mean) / (std + eps) + beta,
        # std is the unbiased (N-1) standard deviation. Exact divide (no
        # approx reciprocal) — this normalizes the residual stream.
        mean = jnp.mean(v, axis=-1, keepdims=True)
        var = jnp.sum((v - mean) ** 2, axis=-1, keepdims=True) * (1.0 / (H - 1))
        return g * (v - mean) / (jnp.sqrt(var) + EPS) + b

    # ---------------- multi-head self-attention (pre-norm) ----------------
    xn = layer_norm(x, g1, b1)
    # Single fused projection: (S, H) @ (H, 3*KD). Query scale is pre-folded
    # into the Q columns of wqkv in the wrapper.
    qkv = jnp.dot(xn, wqkv_ref[...], preferred_element_type=jnp.float32)

    ctx_parts = []
    for h in range(NH):                 # static loop over tiny (S, S) softmaxes
        q = qkv[:, h * DH:(h + 1) * DH]
        k = qkv[:, KD + h * DH:KD + (h + 1) * DH]
        v = qkv[:, 2 * KD + h * DH:2 * KD + (h + 1) * DH]
        logits = jax.lax.dot_general(q, k, (((1,), (1,)), ((), ())),
                                     preferred_element_type=jnp.float32)  # (S, S)
        m = jnp.max(logits, axis=-1, keepdims=True)
        e = jnp.exp(logits - m)
        p = e / jnp.sum(e, axis=-1, keepdims=True)   # exact divide
        ctx_parts.append(jnp.dot(p, v, preferred_element_type=jnp.float32))
    ctx = jnp.concatenate(ctx_parts, axis=-1)        # (S, KD) — lane concat
    attn = jnp.dot(ctx, wo_ref[...], preferred_element_type=jnp.float32)  # (S, H)

    x1 = x + attn  # residual (layer_dropout = 0)

    # ------------ positionwise FFN: conv3 -> relu -> conv3 -> relu ------------
    xn2 = layer_norm(x1, g2, b2)

    pos = jax.lax.broadcasted_iota(jnp.int32, (S, 1), 0)
    first_row = pos == 0
    last_row = pos == S - 1

    def conv3(v, w_ref, bias):
        # "both" padding, kernel_size=3: out[i] = x[i-1]@w0 + x[i]@w1 + x[i+1]@w2
        v_prev = jnp.where(first_row, 0.0, pltpu.roll(v, shift=1, axis=0))
        v_next = jnp.where(last_row, 0.0, pltpu.roll(v, shift=S - 1, axis=0))
        stacked = jnp.concatenate([v_prev, v, v_next], axis=-1)  # (S, 3*in)
        return jnp.dot(stacked, w_ref[...],
                       preferred_element_type=jnp.float32) + bias

    h1 = jnp.maximum(conv3(xn2, c1w_ref, c1b), 0.0)              # (S, F)
    h2 = jnp.maximum(conv3(h1, c2w_ref, c2b), 0.0)               # (S, H)

    o_ref[...] = x1 + h2


@jax.jit
def encoder_layer(x, params):
    g1, b1, wq, wk, wv, wo, g2, b2, c1w, c1b, c2w, c2b = params

    # Weight-side constant transforms (done once by XLA, outside the kernel):
    scale = DH ** -0.5
    wqkv = jnp.concatenate([wq * scale, wk, wv], axis=-1)        # (H, 3*KD)
    ln_pack = jnp.concatenate([g1, b1, g2, b2], axis=0)          # (4, H)
    cb_pack = jnp.concatenate([c1b, c2b], axis=-1)               # (1, F + H)
    c1w_r = c1w.reshape(3 * H, F)                                # (3H, F)
    c2w_r = c2w.reshape(3 * F, H)                                # (3F, H)

    out = pl.pallas_call(
        encoder_layer_kernel,
        out_shape=jax.ShapeDtypeStruct((B, S, H), jnp.float32),
        grid_spec=pltpu.PrefetchScalarGridSpec(
            num_scalar_prefetch=0,
            grid=(B,),
            in_specs=[
                pl.BlockSpec((None, S, H), lambda b: (b, 0, 0)),      # x
                pl.BlockSpec((4, H), lambda b: (0, 0)),               # LN params
                pl.BlockSpec((H, 3 * KD), lambda b: (0, 0)),          # wqkv
                pl.BlockSpec((VD, H), lambda b: (0, 0)),              # wo
                pl.BlockSpec((3 * H, F), lambda b: (0, 0)),           # conv1 w
                pl.BlockSpec((3 * F, H), lambda b: (0, 0)),           # conv2 w
                pl.BlockSpec((1, F + H), lambda b: (0, 0)),           # conv biases
            ],
            out_specs=pl.BlockSpec((None, S, H), lambda b: (b, 0, 0)),
        ),
        compiler_params=pltpu.CompilerParams(
            dimension_semantics=("parallel",)),
    )(x, ln_pack, wqkv, wo, c1w_r, c2w_r, cb_pack)
    return out


def reference(x, params):
    """Pure-JAX reference matching the PyTorch module semantics."""
    g1, b1, wq, wk, wv, wo, g2, b2, c1w, c1b, c2w, c2b = params

    def ln(v, g, b):
        mean = v.mean(-1, keepdims=True)
        var = ((v - mean) ** 2).sum(-1, keepdims=True) / (H - 1)
        return g * (v - mean) / (jnp.sqrt(var) + EPS) + b

    xn = ln(x, g1, b1)
    q, k, v_ = xn @ wq, xn @ wk, xn @ wv

    def split(t):
        return t.reshape(B, S, NH, -1).transpose(0, 2, 1, 3)

    qh = split(q) * (DH ** -0.5)
    kh, vh = split(k), split(v_)
    logits = jnp.einsum('bhqd,bhkd->bhqk', qh, kh)
    w = jax.nn.softmax(logits, axis=-1)
    ctx = jnp.einsum('bhqk,bhkd->bhqd', w, vh).transpose(0, 2, 1, 3).reshape(B, S, VD)
    x1 = x + ctx @ wo

    xn2 = ln(x1, g2, b2)

    def conv3(t, w3, bias):
        tp = jnp.pad(t, ((0, 0), (1, 1), (0, 0)))
        return tp[:, :-2] @ w3[0] + tp[:, 1:-1] @ w3[1] + tp[:, 2:] @ w3[2] + bias

    h1 = jax.nn.relu(conv3(xn2, c1w, c1b))
    h2 = jax.nn.relu(conv3(h1, c2w, c2b))
    return x1 + h2


def init_params(key):
    ks = jax.random.split(key, 8)
    g1 = jnp.ones((1, H), jnp.float32)
    b1 = jnp.zeros((1, H), jnp.float32)
    g2 = jnp.ones((1, H), jnp.float32)
    b2 = jnp.zeros((1, H), jnp.float32)
    wq = 0.1 * jax.random.normal(ks[0], (H, KD), jnp.float32)
    wk = 0.1 * jax.random.normal(ks[1], (H, KD), jnp.float32)
    wv = 0.1 * jax.random.normal(ks[2], (H, VD), jnp.float32)
    wo = 0.1 * jax.random.normal(ks[3], (VD, H), jnp.float32)
    c1w = 0.1 * jax.random.normal(ks[4], (3, H, F), jnp.float32)
    c1b = 0.01 * jax.random.normal(ks[5], (1, F), jnp.float32)
    c2w = 0.1 * jax.random.normal(ks[6], (3, F, H), jnp.float32)
    c2b = 0.01 * jax.random.normal(ks[7], (1, H), jnp.float32)
    return (g1, b1, wq, wk, wv, wo, g2, b2, c1w, c1b, c2w, c2b)


if __name__ == "__main__":
    key = jax.random.PRNGKey(0)
    kx, kp = jax.random.split(key)
    x = jax.random.normal(kx, (B, S, H), jnp.float32)
    params = init_params(kp)

    out = encoder_layer(x, params)
    out = jax.block_until_ready(out)

    ref = reference(x, params)
    assert out.shape == (B, S, H)
    err = float(jnp.max(jnp.abs(out - ref)))
    assert jnp.allclose(out, ref, atol=1e-3, rtol=1e-3), f"max abs err {err}"
    print("KERNEL_OK")
</pallas_src>

<mosaic_0001>
module attributes {stable_mosaic.version = 11 : i64} {
  func.func @encoder_layer_kernel(%arg0: i32, %arg1: memref<1x8x32xf32, #tpu.memory_space<vmem>>, %arg2: memref<4x32xf32, #tpu.memory_space<vmem>>, %arg3: memref<32x96xf32, #tpu.memory_space<vmem>>, %arg4: memref<32x32xf32, #tpu.memory_space<vmem>>, %arg5: memref<96x64xf32, #tpu.memory_space<vmem>>, %arg6: memref<192x32xf32, #tpu.memory_space<vmem>>, %arg7: memref<1x96xf32, #tpu.memory_space<vmem>>, %arg8: memref<1x8x32xf32, #tpu.memory_space<vmem>>) attributes {dimension_semantics = [#tpu.dimension_semantics<parallel>], iteration_bounds = array<i64: 2>, scalar_prefetch = 0 : i64, scratch_operands = 0 : i64, tpu.core_type = #tpu.core_type<tc>, window_params = [{transform_indices = @transform_0, window_bounds = array<i64: 1, 8, 32>}, {pipeline_mode = #tpu.pipeline_mode<synchronous>, transform_indices = @transform_1, window_bounds = array<i64: 4, 32>}, {pipeline_mode = #tpu.pipeline_mode<synchronous>, transform_indices = @transform_2, window_bounds = array<i64: 32, 96>}, {pipeline_mode = #tpu.pipeline_mode<synchronous>, transform_indices = @transform_3, window_bounds = array<i64: 32, 32>}, {pipeline_mode = #tpu.pipeline_mode<synchronous>, transform_indices = @transform_4, window_bounds = array<i64: 96, 64>}, {pipeline_mode = #tpu.pipeline_mode<synchronous>, transform_indices = @transform_5, window_bounds = array<i64: 192, 32>}, {pipeline_mode = #tpu.pipeline_mode<synchronous>, transform_indices = @transform_6, window_bounds = array<i64: 1, 96>}, {transform_indices = @transform_7, window_bounds = array<i64: 1, 8, 32>}]} {
    %c0 = arith.constant 0 : index
    %c0_0 = arith.constant 0 : index
    %c0_1 = arith.constant 0 : index
    %0 = vector.load %arg1[%c0, %c0_0, %c0_1] : memref<1x8x32xf32, #tpu.memory_space<vmem>>, vector<1x8x32xf32>
    %1 = vector.shape_cast %0 : vector<1x8x32xf32> to vector<8x32xf32>
    %c0_2 = arith.constant 0 : index
    %c0_3 = arith.constant 0 : index
    %2 = vector.load %arg2[%c0_2, %c0_3] : memref<4x32xf32, #tpu.memory_space<vmem>>, vector<4x32xf32>
    %3 = vector.extract_strided_slice %2 {offsets = [0, 0], sizes = [1, 32], strides = [1, 1]} : vector<4x32xf32> to vector<1x32xf32>
    %4 = vector.extract_strided_slice %2 {offsets = [1, 0], sizes = [1, 32], strides = [1, 1]} : vector<4x32xf32> to vector<1x32xf32>
    %5 = vector.extract_strided_slice %2 {offsets = [2, 0], sizes = [1, 32], strides = [1, 1]} : vector<4x32xf32> to vector<1x32xf32>
    %6 = vector.extract_strided_slice %2 {offsets = [3, 0], sizes = [1, 32], strides = [1, 1]} : vector<4x32xf32> to vector<1x32xf32>
    %c0_4 = arith.constant 0 : index
    %c0_5 = arith.constant 0 : index
    %7 = vector.load %arg7[%c0_4, %c0_5] : memref<1x96xf32, #tpu.memory_space<vmem>>, vector<1x96xf32>
    %8 = vector.extract_strided_slice %7 {offsets = [0, 0], sizes = [1, 64], strides = [1, 1]} : vector<1x96xf32> to vector<1x64xf32>
    %9 = vector.extract_strided_slice %7 {offsets = [0, 64], sizes = [1, 32], strides = [1, 1]} : vector<1x96xf32> to vector<1x32xf32>
    %cst = arith.constant dense<0.000000e+00> : vector<8xf32>
    %10 = vector.multi_reduction <add>, %1, %cst [1] : vector<8x32xf32> to vector<8xf32>
    %11 = vector.shape_cast %10 : vector<8xf32> to vector<8x1xf32>
    %cst_6 = arith.constant 3.200000e+01 : f32
    %12 = vector.broadcast %cst_6 : f32 to vector<8x1xf32>
    %13 = arith.divf %11, %12 : vector<8x1xf32>
    %14 = vector.broadcast %13 : vector<8x1xf32> to vector<8x32xf32>
    %15 = arith.subf %1, %14 : vector<8x32xf32>
    %16 = arith.mulf %15, %15 : vector<8x32xf32>
    %cst_7 = arith.constant dense<0.000000e+00> : vector<8xf32>
    %17 = vector.multi_reduction <add>, %16, %cst_7 [1] : vector<8x32xf32> to vector<8xf32>
    %18 = vector.shape_cast %17 : vector<8xf32> to vector<8x1xf32>
    %cst_8 = arith.constant 0.0322580636 : f32
    %19 = vector.broadcast %cst_8 : f32 to vector<8x1xf32>
    %20 = arith.mulf %18, %19 : vector<8x1xf32>
    %21 = vector.broadcast %13 : vector<8x1xf32> to vector<8x32xf32>
    %22 = arith.subf %1, %21 : vector<8x32xf32>
    %23 = vector.broadcast %3 : vector<1x32xf32> to vector<8x32xf32>
    %24 = arith.mulf %23, %22 : vector<8x32xf32>
    %25 = math.sqrt %20 : vector<8x1xf32>
    %cst_9 = arith.constant 9.99999997E-7 : f32
    %26 = vector.broadcast %cst_9 : f32 to vector<8x1xf32>
    %27 = arith.addf %25, %26 : vector<8x1xf32>
    %28 = vector.broadcast %27 : vector<8x1xf32> to vector<8x32xf32>
    %29 = arith.divf %24, %28 : vector<8x32xf32>
    %30 = vector.broadcast %4 : vector<1x32xf32> to vector<8x32xf32>
    %31 = arith.addf %29, %30 : vector<8x32xf32>
    %c0_10 = arith.constant 0 : index
    %c0_11 = arith.constant 0 : index
    %32 = vector.load %arg3[%c0_10, %c0_11] : memref<32x96xf32, #tpu.memory_space<vmem>>, vector<32x96xf32>
    %cst_12 = arith.constant dense<0.000000e+00> : vector<8x96xf32>
    %33 = tpu.matmul %31, %32, %cst_12 {dimension_numbers = #tpu.dot_dimension_numbers<[1], [0], [0], [1], [0, 0, 1, 1], [], []>} : vector<8x32xf32>, vector<32x96xf32>, vector<8x96xf32> -> vector<8x96xf32>
    %34 = vector.extract_strided_slice %33 {offsets = [0, 0], sizes = [8, 8], strides = [1, 1]} : vector<8x96xf32> to vector<8x8xf32>
    %35 = vector.extract_strided_slice %33 {offsets = [0, 32], sizes = [8, 8], strides = [1, 1]} : vector<8x96xf32> to vector<8x8xf32>
    %36 = vector.extract_strided_slice %33 {offsets = [0, 64], sizes = [8, 8], strides = [1, 1]} : vector<8x96xf32> to vector<8x8xf32>
    %cst_13 = arith.constant dense<0.000000e+00> : vector<8x8xf32>
    %37 = tpu.matmul %34, %35, %cst_13 {dimension_numbers = #tpu.dot_dimension_numbers<[1], [1], [0], [0], [0, 0, 1, 0], [], []>} : vector<8x8xf32>, vector<8x8xf32>, vector<8x8xf32> -> vector<8x8xf32>
    %cst_14 = arith.constant dense<0xFF800000> : vector<8xf32>
    %38 = vector.multi_reduction <maximumf>, %37, %cst_14 [1] : vector<8x8xf32> to vector<8xf32>
    %39 = vector.shape_cast %38 : vector<8xf32> to vector<8x1xf32>
    %40 = vector.broadcast %39 : vector<8x1xf32> to vector<8x8xf32>
    %41 = arith.subf %37, %40 : vector<8x8xf32>
    %42 = math.exp %41 : vector<8x8xf32>
    %cst_15 = arith.constant dense<0.000000e+00> : vector<8xf32>
    %43 = vector.multi_reduction <add>, %42, %cst_15 [1] : vector<8x8xf32> to vector<8xf32>
    %44 = vector.shape_cast %43 : vector<8xf32> to vector<8x1xf32>
    %45 = vector.broadcast %44 : vector<8x1xf32> to vector<8x8xf32>
    %46 = arith.divf %42, %45 : vector<8x8xf32>
    %cst_16 = arith.constant dense<0.000000e+00> : vector<8x8xf32>
    %47 = tpu.matmul %46, %36, %cst_16 {dimension_numbers = #tpu.dot_dimension_numbers<[1], [0], [0], [1], [0, 0, 1, 1], [], []>} : vector<8x8xf32>, vector<8x8xf32>, vector<8x8xf32> -> vector<8x8xf32>
    %48 = vector.extract_strided_slice %33 {offsets = [0, 8], sizes = [8, 8], strides = [1, 1]} : vector<8x96xf32> to vector<8x8xf32>
    %49 = vector.extract_strided_slice %33 {offsets = [0, 40], sizes = [8, 8], strides = [1, 1]} : vector<8x96xf32> to vector<8x8xf32>
    %50 = vector.extract_strided_slice %33 {offsets = [0, 72], sizes = [8, 8], strides = [1, 1]} : vector<8x96xf32> to vector<8x8xf32>
    %cst_17 = arith.constant dense<0.000000e+00> : vector<8x8xf32>
    %51 = tpu.matmul %48, %49, %cst_17 {dimension_numbers = #tpu.dot_dimension_numbers<[1], [1], [0], [0], [0, 0, 1, 0], [], []>} : vector<8x8xf32>, vector<8x8xf32>, vector<8x8xf32> -> vector<8x8xf32>
    %cst_18 = arith.constant dense<0xFF800000> : vector<8xf32>
    %52 = vector.multi_reduction <maximumf>, %51, %cst_18 [1] : vector<8x8xf32> to vector<8xf32>
    %53 = vector.shape_cast %52 : vector<8xf32> to vector<8x1xf32>
    %54 = vector.broadcast %53 : vector<8x1xf32> to vector<8x8xf32>
    %55 = arith.subf %51, %54 : vector<8x8xf32>
    %56 = math.exp %55 : vector<8x8xf32>
    %cst_19 = arith.constant dense<0.000000e+00> : vector<8xf32>
    %57 = vector.multi_reduction <add>, %56, %cst_19 [1] : vector<8x8xf32> to vector<8xf32>
    %58 = vector.shape_cast %57 : vector<8xf32> to vector<8x1xf32>
    %59 = vector.broadcast %58 : vector<8x1xf32> to vector<8x8xf32>
    %60 = arith.divf %56, %59 : vector<8x8xf32>
    %cst_20 = arith.constant dense<0.000000e+00> : vector<8x8xf32>
    %61 = tpu.matmul %60, %50, %cst_20 {dimension_numbers = #tpu.dot_dimension_numbers<[1], [0], [0], [1], [0, 0, 1, 1], [], []>} : vector<8x8xf32>, vector<8x8xf32>, vector<8x8xf32> -> vector<8x8xf32>
    %62 = vector.extract_strided_slice %33 {offsets = [0, 16], sizes = [8, 8], strides = [1, 1]} : vector<8x96xf32> to vector<8x8xf32>
    %63 = vector.extract_strided_slice %33 {offsets = [0, 48], sizes = [8, 8], strides = [1, 1]} : vector<8x96xf32> to vector<8x8xf32>
    %64 = vector.extract_strided_slice %33 {offsets = [0, 80], sizes = [8, 8], strides = [1, 1]} : vector<8x96xf32> to vector<8x8xf32>
    %cst_21 = arith.constant dense<0.000000e+00> : vector<8x8xf32>
    %65 = tpu.matmul %62, %63, %cst_21 {dimension_numbers = #tpu.dot_dimension_numbers<[1], [1], [0], [0], [0, 0, 1, 0], [], []>} : vector<8x8xf32>, vector<8x8xf32>, vector<8x8xf32> -> vector<8x8xf32>
    %cst_22 = arith.constant dense<0xFF800000> : vector<8xf32>
    %66 = vector.multi_reduction <maximumf>, %65, %cst_22 [1] : vector<8x8xf32> to vector<8xf32>
    %67 = vector.shape_cast %66 : vector<8xf32> to vector<8x1xf32>
    %68 = vector.broadcast %67 : vector<8x1xf32> to vector<8x8xf32>
    %69 = arith.subf %65, %68 : vector<8x8xf32>
    %70 = math.exp %69 : vector<8x8xf32>
    %cst_23 = arith.constant dense<0.000000e+00> : vector<8xf32>
    %71 = vector.multi_reduction <add>, %70, %cst_23 [1] : vector<8x8xf32> to vector<8xf32>
    %72 = vector.shape_cast %71 : vector<8xf32> to vector<8x1xf32>
    %73 = vector.broadcast %72 : vector<8x1xf32> to vector<8x8xf32>
    %74 = arith.divf %70, %73 : vector<8x8xf32>
    %cst_24 = arith.constant dense<0.000000e+00> : vector<8x8xf32>
    %75 = tpu.matmul %74, %64, %cst_24 {dimension_numbers = #tpu.dot_dimension_numbers<[1], [0], [0], [1], [0, 0, 1, 1], [], []>} : vector<8x8xf32>, vector<8x8xf32>, vector<8x8xf32> -> vector<8x8xf32>
    %76 = vector.extract_strided_slice %33 {offsets = [0, 24], sizes = [8, 8], strides = [1, 1]} : vector<8x96xf32> to vector<8x8xf32>
    %77 = vector.extract_strided_slice %33 {offsets = [0, 56], sizes = [8, 8], strides = [1, 1]} : vector<8x96xf32> to vector<8x8xf32>
    %78 = vector.extract_strided_slice %33 {offsets = [0, 88], sizes = [8, 8], strides = [1, 1]} : vector<8x96xf32> to vector<8x8xf32>
    %cst_25 = arith.constant dense<0.000000e+00> : vector<8x8xf32>
    %79 = tpu.matmul %76, %77, %cst_25 {dimension_numbers = #tpu.dot_dimension_numbers<[1], [1], [0], [0], [0, 0, 1, 0], [], []>} : vector<8x8xf32>, vector<8x8xf32>, vector<8x8xf32> -> vector<8x8xf32>
    %cst_26 = arith.constant dense<0xFF800000> : vector<8xf32>
    %80 = vector.multi_reduction <maximumf>, %79, %cst_26 [1] : vector<8x8xf32> to vector<8xf32>
    %81 = vector.shape_cast %80 : vector<8xf32> to vector<8x1xf32>
    %82 = vector.broadcast %81 : vector<8x1xf32> to vector<8x8xf32>
    %83 = arith.subf %79, %82 : vector<8x8xf32>
    %84 = math.exp %83 : vector<8x8xf32>
    %cst_27 = arith.constant dense<0.000000e+00> : vector<8xf32>
    %85 = vector.multi_reduction <add>, %84, %cst_27 [1] : vector<8x8xf32> to vector<8xf32>
    %86 = vector.shape_cast %85 : vector<8xf32> to vector<8x1xf32>
    %87 = vector.broadcast %86 : vector<8x1xf32> to vector<8x8xf32>
    %88 = arith.divf %84, %87 : vector<8x8xf32>
    %cst_28 = arith.constant dense<0.000000e+00> : vector<8x8xf32>
    %89 = tpu.matmul %88, %78, %cst_28 {dimension_numbers = #tpu.dot_dimension_numbers<[1], [0], [0], [1], [0, 0, 1, 1], [], []>} : vector<8x8xf32>, vector<8x8xf32>, vector<8x8xf32> -> vector<8x8xf32>
    %90 = tpu.concatenate %47, %61, %75, %89 in 1 : vector<8x8xf32>, vector<8x8xf32>, vector<8x8xf32>, vector<8x8xf32> -> vector<8x32xf32>
    %c0_29 = arith.constant 0 : index
    %c0_30 = arith.constant 0 : index
    %91 = vector.load %arg4[%c0_29, %c0_30] : memref<32x32xf32, #tpu.memory_space<vmem>>, vector<32x32xf32>
    %cst_31 = arith.constant dense<0.000000e+00> : vector<8x32xf32>
    %92 = tpu.matmul %90, %91, %cst_31 {dimension_numbers = #tpu.dot_dimension_numbers<[1], [0], [0], [1], [0, 0, 1, 1], [], []>} : vector<8x32xf32>, vector<32x32xf32>, vector<8x32xf32> -> vector<8x32xf32>
    %93 = arith.addf %1, %92 : vector<8x32xf32>
    %cst_32 = arith.constant dense<0.000000e+00> : vector<8xf32>
    %94 = vector.multi_reduction <add>, %93, %cst_32 [1] : vector<8x32xf32> to vector<8xf32>
    %95 = vector.shape_cast %94 : vector<8xf32> to vector<8x1xf32>
    %cst_33 = arith.constant 3.200000e+01 : f32
    %96 = vector.broadcast %cst_33 : f32 to vector<8x1xf32>
    %97 = arith.divf %95, %96 : vector<8x1xf32>
    %98 = vector.broadcast %97 : vector<8x1xf32> to vector<8x32xf32>
    %99 = arith.subf %93, %98 : vector<8x32xf32>
    %100 = arith.mulf %99, %99 : vector<8x32xf32>
    %cst_34 = arith.constant dense<0.000000e+00> : vector<8xf32>
    %101 = vector.multi_reduction <add>, %100, %cst_34 [1] : vector<8x32xf32> to vector<8xf32>
    %102 = vector.shape_cast %101 : vector<8xf32> to vector<8x1xf32>
    %cst_35 = arith.constant 0.0322580636 : f32
    %103 = vector.broadcast %cst_35 : f32 to vector<8x1xf32>
    %104 = arith.mulf %102, %103 : vector<8x1xf32>
    %105 = vector.broadcast %97 : vector<8x1xf32> to vector<8x32xf32>
    %106 = arith.subf %93, %105 : vector<8x32xf32>
    %107 = vector.broadcast %5 : vector<1x32xf32> to vector<8x32xf32>
    %108 = arith.mulf %107, %106 : vector<8x32xf32>
    %109 = math.sqrt %104 : vector<8x1xf32>
    %cst_36 = arith.constant 9.99999997E-7 : f32
    %110 = vector.broadcast %cst_36 : f32 to vector<8x1xf32>
    %111 = arith.addf %109, %110 : vector<8x1xf32>
    %112 = vector.broadcast %111 : vector<8x1xf32> to vector<8x32xf32>
    %113 = arith.divf %108, %112 : vector<8x32xf32>
    %114 = vector.broadcast %6 : vector<1x32xf32> to vector<8x32xf32>
    %115 = arith.addf %113, %114 : vector<8x32xf32>
    %116 = tpu.iota {dimensions = array<i32: 0>} : vector<8x1xi32>
    %c0_i32 = arith.constant 0 : i32
    %117 = vector.broadcast %c0_i32 : i32 to vector<8x1xi32>
    %118 = arith.cmpi eq, %116, %117 : vector<8x1xi32>
    %c7_i32 = arith.constant 7 : i32
    %119 = vector.broadcast %c7_i32 : i32 to vector<8x1xi32>
    %120 = arith.cmpi eq, %116, %119 : vector<8x1xi32>
    %c1_i32 = arith.constant 1 : i32
    %121 = tpu.dynamic_rotate %115 by %c1_i32 dim 0 : vector<8x32xf32>, i32 -> vector<8x32xf32>
    %cst_37 = arith.constant 0.000000e+00 : f32
    %122 = vector.shape_cast %118 : vector<8x1xi1> to vector<8x1xi1>
    %123 = vector.broadcast %122 : vector<8x1xi1> to vector<8x32xi1>
    %124 = vector.broadcast %cst_37 : f32 to vector<8x32xf32>
    %125 = arith.select %123, %124, %121 : vector<8x32xi1>, vector<8x32xf32>
    %c7_i32_38 = arith.constant 7 : i32
    %126 = tpu.dynamic_rotate %115 by %c7_i32_38 dim 0 : vector<8x32xf32>, i32 -> vector<8x32xf32>
    %cst_39 = arith.constant 0.000000e+00 : f32
    %127 = vector.shape_cast %120 : vector<8x1xi1> to vector<8x1xi1>
    %128 = vector.broadcast %127 : vector<8x1xi1> to vector<8x32xi1>
    %129 = vector.broadcast %cst_39 : f32 to vector<8x32xf32>
    %130 = arith.select %128, %129, %126 : vector<8x32xi1>, vector<8x32xf32>
    %131 = tpu.concatenate %125, %115, %130 in 1 : vector<8x32xf32>, vector<8x32xf32>, vector<8x32xf32> -> vector<8x96xf32>
    %c0_40 = arith.constant 0 : index
    %c0_41 = arith.constant 0 : index
    %132 = vector.load %arg5[%c0_40, %c0_41] : memref<96x64xf32, #tpu.memory_space<vmem>>, vector<96x64xf32>
    %cst_42 = arith.constant dense<0.000000e+00> : vector<8x64xf32>
    %133 = tpu.matmul %131, %132, %cst_42 {dimension_numbers = #tpu.dot_dimension_numbers<[1], [0], [0], [1], [0, 0, 1, 1], [], []>} : vector<8x96xf32>, vector<96x64xf32>, vector<8x64xf32> -> vector<8x64xf32>
    %134 = vector.broadcast %8 : vector<1x64xf32> to vector<8x64xf32>
    %135 = arith.addf %133, %134 : vector<8x64xf32>
    %cst_43 = arith.constant 0.000000e+00 : f32
    %136 = vector.broadcast %cst_43 : f32 to vector<8x64xf32>
    %137 = arith.maximumf %135, %136 : vector<8x64xf32>
    %c1_i32_44 = arith.constant 1 : i32
    %138 = tpu.dynamic_rotate %137 by %c1_i32_44 dim 0 : vector<8x64xf32>, i32 -> vector<8x64xf32>
    %cst_45 = arith.constant 0.000000e+00 : f32
    %139 = vector.shape_cast %118 : vector<8x1xi1> to vector<8x1xi1>
    %140 = vector.broadcast %139 : vector<8x1xi1> to vector<8x64xi1>
    %141 = vector.broadcast %cst_45 : f32 to vector<8x64xf32>
    %142 = arith.select %140, %141, %138 : vector<8x64xi1>, vector<8x64xf32>
    %c7_i32_46 = arith.constant 7 : i32
    %143 = tpu.dynamic_rotate %137 by %c7_i32_46 dim 0 : vector<8x64xf32>, i32 -> vector<8x64xf32>
    %cst_47 = arith.constant 0.000000e+00 : f32
    %144 = vector.shape_cast %120 : vector<8x1xi1> to vector<8x1xi1>
    %145 = vector.broadcast %144 : vector<8x1xi1> to vector<8x64xi1>
    %146 = vector.broadcast %cst_47 : f32 to vector<8x64xf32>
    %147 = arith.select %145, %146, %143 : vector<8x64xi1>, vector<8x64xf32>
    %148 = tpu.concatenate %142, %137, %147 in 1 : vector<8x64xf32>, vector<8x64xf32>, vector<8x64xf32> -> vector<8x192xf32>
    %c0_48 = arith.constant 0 : index
    %c0_49 = arith.constant 0 : index
    %149 = vector.load %arg6[%c0_48, %c0_49] : memref<192x32xf32, #tpu.memory_space<vmem>>, vector<192x32xf32>
    %cst_50 = arith.constant dense<0.000000e+00> : vector<8x32xf32>
    %150 = tpu.matmul %148, %149, %cst_50 {dimension_numbers = #tpu.dot_dimension_numbers<[1], [0], [0], [1], [0, 0, 1, 1], [], []>} : vector<8x192xf32>, vector<192x32xf32>, vector<8x32xf32> -> vector<8x32xf32>
    %151 = vector.broadcast %9 : vector<1x32xf32> to vector<8x32xf32>
    %152 = arith.addf %150, %151 : vector<8x32xf32>
    %cst_51 = arith.constant 0.000000e+00 : f32
    %153 = vector.broadcast %cst_51 : f32 to vector<8x32xf32>
    %154 = arith.maximumf %152, %153 : vector<8x32xf32>
    %155 = arith.addf %93, %154 : vector<8x32xf32>
    %c0_52 = arith.constant 0 : index
    %c0_53 = arith.constant 0 : index
    %c0_54 = arith.constant 0 : index
    %156 = vector.load %arg8[%c0_52, %c0_53, %c0_54] : memref<1x8x32xf32, #tpu.memory_space<vmem>>, vector<1x8x32xf32>
    %157 = vector.shape_cast %156 : vector<1x8x32xf32> to vector<8x32xf32>
    %158 = vector.shape_cast %155 : vector<8x32xf32> to vector<1x8x32xf32>
    tpu.vector_store %arg8[%c0_52, %c0_53, %c0_54], %158 {strides = array<i32>} : memref<1x8x32xf32, #tpu.memory_space<vmem>>, vector<1x8x32xf32>,
    return
  }
  func.func @transform_0(%arg0: i32) -> (i32, i32, i32) {
    %c0_i32 = arith.constant 0 : i32
    %c0_i32_0 = arith.constant 0 : i32
    %c0_i32_1 = arith.constant 0 : i32
    return %arg0, %c0_i32, %c0_i32_0 : i32, i32, i32
  }
  func.func @transform_1(%arg0: i32) -> (i32, i32) {
    %c0_i32 = arith.constant 0 : i32
    %c0_i32_0 = arith.constant 0 : i32
    %c0_i32_1 = arith.constant 0 : i32
    return %c0_i32, %c0_i32_0 : i32, i32
  }
  func.func @transform_2(%arg0: i32) -> (i32, i32) {
    %c0_i32 = arith.constant 0 : i32
    %c0_i32_0 = arith.constant 0 : i32
    %c0_i32_1 = arith.constant 0 : i32
    return %c0_i32, %c0_i32_0 : i32, i32
  }
  func.func @transform_3(%arg0: i32) -> (i32, i32) {
    %c0_i32 = arith.constant 0 : i32
    %c0_i32_0 = arith.constant 0 : i32
    %c0_i32_1 = arith.constant 0 : i32
    return %c0_i32, %c0_i32_0 : i32, i32
  }
  func.func @transform_4(%arg0: i32) -> (i32, i32) {
    %c0_i32 = arith.constant 0 : i32
    %c0_i32_0 = arith.constant 0 : i32
    %c0_i32_1 = arith.constant 0 : i32
    return %c0_i32, %c0_i32_0 : i32, i32
  }
  func.func @transform_5(%arg0: i32) -> (i32, i32) {
    %c0_i32 = arith.constant 0 : i32
    %c0_i32_0 = arith.constant 0 : i32
    %c0_i32_1 = arith.constant 0 : i32
    return %c0_i32, %c0_i32_0 : i32, i32
  }
  func.func @transform_6(%arg0: i32) -> (i32, i32) {
    %c0_i32 = arith.constant 0 : i32
    %c0_i32_0 = arith.constant 0 : i32
    %c0_i32_1 = arith.constant 0 : i32
    return %c0_i32, %c0_i32_0 : i32, i32
  }
  func.func @transform_7(%arg0: i32) -> (i32, i32, i32) {
    %c0_i32 = arith.constant 0 : i32
    %c0_i32_0 = arith.constant 0 : i32
    %c0_i32_1 = arith.constant 0 : i32
    return %arg0, %c0_i32, %c0_i32_0 : i32, i32, i32
  }
}

</mosaic_0001>

<bundles_post_ra>
// kernel: encoder_layer.1
= control target key start
LH: loop header
LB: loop body
LE: loop exit
PB: predicated region body
PF: predicated region fallthrough
CT: control target
= control target key end

     0   :  { %12 = vsyncpa [#allocation3], 0  ;;  %s2212_s0 = inlined_call_operand.vmem [shape: f32[2,8,32], index: 0, kind: input, shape index: {}]   ;;  %s2213_s1 = inlined_call_operand.vmem [shape: f32[4,32], index: 1, kind: input, shape index: {}]   ;;  %s2214_s2 = inlined_call_operand.vmem [shape: f32[32,96], index: 2, kind: input, shape index: {}]   ;;  %s2215_s3 = inlined_call_operand.vmem [shape: f32[32,32], index: 3, kind: input, shape index: {}]   ;;  %s2216_s4 = inlined_call_operand.vmem [shape: f32[96,64], index: 4, kind: input, shape index: {}]   ;;  %s2217_s5 = inlined_call_operand.vmem [shape: f32[192,32], index: 5, kind: input, shape index: {}]   ;;  %s2218_s6 = inlined_call_operand.vmem [shape: f32[1,96], index: 6, kind: input, shape index: {}]   ;;  %s2219_s7 = inlined_call_operand.hbm [shape: f32[2,8,32], index: 7, kind: output, shape index: {}]  }
   0x1   :  { %14 = vsyncpa [#allocation3 + $0x1], 0  ;;  %s1827_s24 = smov 0   ;;  %s1829_s25 = smov 0  }
   0x2   :  { %s1831_s26 = smov 0   ;;  %s1833_s27 = smov 0  }
   0x3 LB: > { %s1848_s28 = sadd.s32 4294967295, %s1767_s27   ;;  %s1472_s29 = sadd.s32 4294967294, %s1767_s27   ;;  %s1767_s27 = sphi %s1833_s27, %s2225_s27   ;;  %s1763_s26 = sphi %s1831_s26, %s2224_s26   ;;  %s1759_s25 = sphi %s1829_s25, %s2223_s25   ;;  %s1755_s24 = sphi %s1827_s24, %s2222_s24  }
   0x4   : > { %s1852_s30 = sadd.s32 1, %s1767_s27   ;;  %s179_s8 = sadd.s32 1, %s1763_s26 }
   0x5   : > { %s176_s9 = ssub.s32 %s1767_s27, %s1852_s30  ;;  %p189_p0 = scmp.ne.s32.totalorder %s1763_s26, %s1759_s25 }
   0x6   : > { %p177_p1 = scmp.eq.s32.totalorder %s176_s9, 0  ;;  %p190_p2 = scmp.eq.s32.totalorder %s1848_s28, 1 }
   0x7   : > { %p195_p3 = scmp.ne.s32.totalorder %s1759_s25, %s1755_s24  ;;  %p196_p4 = scmp.eq.s32.totalorder %s1472_s29, 1 }
   0x8   : > { %s1863_s10 = scalar_select %p177_p1, %s1763_s26, %s179_s8  }
   0x9   : > { %p1865_p5 = por %p190_p2, %p189_p0  ;;  %p1869_p6 = por %p196_p4, %p195_p3 }
   0xa   : > { %p1475_p7 = scmp.ge.s32.totalorder %s1767_s27, 1  ;;  %p239_p8 = scmp.lt.s32.totalorder %s1767_s27, 3 }
   0xc   : > { %p240_p9 = pnand %p1475_p7, %p239_p8 }
   0xd   : > { %p270_p10 = scmp.lt.s32.totalorder (!%p240_p9), %s1848_s28, 1  ;;  %s1772_s15 = smov (!%p240_p9), 96  }
   0xe   : > { %243 = sbr.rel (%p240_p9) target bundleno = 2653 (0xa5d), region = 48  ;;  %s1773_s16 = smov (!%p240_p9), 88  }
   0xf   : > { %s1775_s18 = smov (!%p240_p9), 112   ;;  %s1776_s19 = smov (!%p240_p9), 72  }
  0x10   : > { %s1777_s20 = smov (!%p240_p9), 104   ;;  %s1778_s21 = smov (!%p240_p9), 64  }
  0x11   : > { %s1779_s22 = smov (!%p240_p9), 48   ;;  %s1780_s23 = smov (!%p240_p9), 40  }
  0x12   : > { %s1781_s29 = smov (!%p240_p9), 56  }
  0x13   : > { %s271_s13 = scalar_select %p270_p10, %s1848_s28, 1  ;;  %vm277_vm0 = vcmask 261120   ;;  %v312_v7 = vld [vmem:[%s2214_s2 + $0x18] sm:$0xff]  ;;  %v1769_v8 = vmov 0.0   ;;  %v311_v9 = vld [vmem:[%s2214_s2 + $0x10] sm:$0xff]  ;;  %vm1770_vm1 = vmmov 0   ;;  %v289_v17 = vlaneseq }
  0x14   : > { %1538 = vmatprep.subr.mxu1 %v1769_v8  ;;  %1546 = vmatprep.mubr.msk.f32.mxu1 %vm1770_vm1, %v1769_v8  ;;  %v310_v10 = vld [vmem:[%s2214_s2 + $0x8] sm:$0xff]  ;;  %v309_v11 = vld [vmem:[%s2214_s2] sm:$0xff]  ;;  %vm389_vm4 = vcmask 64512   ;;  %vm1059_vm5 = vcmask 130048   ;;  %vm1061_vm6 = vcmask 195584   ;;  %vm1192_vm11 = vcmask 523264  }
  0x15   : > { %s1477_s14 = sshll.u32 %s271_s13, 3  ;;  %1539 = vmatpush3.msra.mxu1 %v312_v7  ;;  %1559 = vmatprep.subr.mxu0 %v1769_v8  ;;  %v1908_v21 = vshrl.u32 %v289_v17, 7  ;;  %v1914_v23 = vld [vmem:[%s2213_s1] sm:$0xf]  ;;  %vm1212_vm12 = vcmask 785408  }
  0x16   : > { %s273_s17 = scalar_lea.vmem %s2212_s0, %s1477_s14  ;;  %1540 = vmatprep.subr.mxu1 %v1769_v8  ;;  %1561 = vmatprep.mubr.msk.f32.mxu0 %vm1770_vm1, %v1769_v8  ;;  %s1771_s14 = smov 120  }
  0x17   : > { %v1880_v0 = vld [vmem:[%s273_s17] sm:$0xff]  ;;  %1541 = vmatpush3.msra.mxu1 %v311_v9  ;;  %v291_v22 = vsub.s32 0, %v1908_v21  ;;  %v306_v25 = vsub.s32 1, %v1908_v21  ;;  %s1774_s17 = smov 80   ;;  %vm1174_vm9 = vcmp.eq.s32.totalorder %v1908_v21, 7  ;;  %vm1173_vm10 = vcmp.eq.s32.totalorder %v1908_v21, 0 }
  0x18   : > { %v278_v1 = vsel %vm277_vm0, %v1880_v0, 0.0  ;;  %1542 = vmatprep.subr.mxu1 %v1769_v8 }
  0x19   : > { %279 = vadd.xlane.f32.xlu0 %v278_v1  ;;  %1543 = vmatpush3.msra.mxu1 %v310_v10  ;;  %v292_v24 = vrot.slane %v1914_v23, %v291_v22  ;;  %v307_v27 = vrot.slane %v1914_v23, %v306_v25 }
  0x1a   : > { %1544 = vmatprep.subr.mxu1 %v1769_v8 }
  0x1b   : > { %1545 = vmatpush3.msra.mxu1 %v309_v11 }
  0x1c   : > { %1549 = vmatprep.subr.mxu1 %v1769_v8 }
  0xa2   : > { %v280_v2 = vpop.xlane.xlu0 %279 }
  0xa3   : > { %v282_v3 = vmul.f32 0.03125, %v280_v2 }
  0xa5   : > { %v283_v4 = vsub.f32 %v1880_v0, %v282_v3 }
  0xa7   : > { %v284_v5 = vmul.f32 %v283_v4, %v283_v4  ;;  %v293_v26 = vmul.f32 %v292_v24, %v283_v4 }
  0xa9   : > { %v285_v6 = vsel %vm277_vm0, %v284_v5, 0.0 }
  0xaa   : > { %286 = vadd.xlane.f32.xlu0 %v285_v6 }
 0x133   : > { %v287_v12 = vpop.xlane.xlu0 %286 }
 0x134   : > { %v288_v13 = vmul.f32 0.032258064, %v287_v12 }
 0x136   : > { %1683 = vrsqrt.f32 %v288_v13  ;;  %vm296_vm2 = vcmp.eq.f32.partialorder %v288_v13, inf  ;;  %v299_v16 = vand.u32 2147483648, %v288_v13  ;;  %vm298_vm3 = vcmp.eq.f32.partialorder %v288_v13, 0.0 }
 0x143   : > { %v1684_v14 = vpop.eup %1683 }
 0x144   : > { %v295_v15 = vmul.f32 %v1684_v14, %v288_v13 }
 0x146   : > { %v297_v18 = vsel %vm296_vm2, %v288_v13, %v295_v15 }
 0x147   : > { %v300_v19 = vsel %vm298_vm3, %v299_v16, %v297_v18 }
 0x148   : > { %v301_v20 = vadd.f32 1e-06, %v300_v19 }
 0x14a   : > { %1685 = vrcp.f32 %v301_v20 }
 0x157   : > { %v1686_v28 = vpop.eup %1685 }
 0x158   : > { %v303_v29 = vmul.f32 %v1686_v28, %v293_v26  ;;  %v1066_v28 = vld [vmem:[%s2215_s3 + $0x18] sm:$0xff] }
 0x15a   : > { %v308_v30 = vadd.f32 %v307_v27, %v303_v29  ;;  %v1065_v29 = vld [vmem:[%s2215_s3 + $0x10] sm:$0xff] }
 0x15c   : > { %1547 = vmatmul.mubr.msk.f32.vlgmr.msra.gmra.mxu1 %vm277_vm0, %v308_v30 }
 0x15d   : > { %1551 = vmatprep.mubr.msk.f32.mxu1 %vm1770_vm1, %v1769_v8 }
 0x21c   : > { %v1922_v31 = vpop.f32.mrf.mxu1 }
 0x21d   : > { %551 = vrot.lane.b32.xlu0 %v1922_v31, %s1771_s14  ;;  %387 = vrot.lane.b32.xlu1 %v1922_v31, %s1772_s15  ;;  %s1786_s15 = smov [#allocation2]  }
 0x21e   : > { %v1548_v32 = vpop.f32.mrf.mxu1 }
 0x221   : > { %553 = vrot.lane.b32.xlu1 %v1922_v31, %s1773_s16 }
 0x225   : > { %718 = vrot.lane.b32.xlu1 %v1922_v31, %s1774_s17 }
 0x229   : > { %716 = vrot.lane.b32.xlu1 %v1922_v31, %s1775_s18 }
 0x22d   : > { %883 = vrot.lane.b32.xlu1 %v1922_v31, %s1776_s19  ;;  %s1782_s19 = smov 8  }
 0x231   : > { %881 = vrot.lane.b32.xlu1 %v1922_v31, %s1777_s20  ;;  %s1783_s20 = smov 16  }
 0x28f   : > { %v388_v33 = vpop.permute.xlu1 %387  ;;  %v552_v35 = vpop.permute.xlu0 %551 }
 0x290   : > { %1550 = vmatpush3.xpose.msk.msra.mxu1 %vm389_vm4, %v388_v33  ;;  %v1063_v33 = vld [vmem:[%s2215_s3] sm:$0xff] }
 0x291   : > { %1554 = vmatprep.subr.mxu1 %v1769_v8 }
 0x293   : > { %1552 = vmatmul.mubr.msk.f32.vlgmr.msra.gmra.mxu1 %vm389_vm4, %v1922_v31  ;;  %v554_v34 = vpop.permute.xlu1 %553 }
 0x294   : > { %1560 = vmatpush3.xpose.msk.msra.mxu0 %vm389_vm4, %v554_v34  ;;  %1556 = vmatprep.mubr.msk.f32.mxu1 %vm1770_vm1, %v1769_v8 }
 0x295   : > { %1569 = vmatprep.subr.mxu0 %v1769_v8 }
 0x297   : > { %1562 = vmatmul.mubr.msk.f32.vlgmr.msra.gmra.mxu0 %vm389_vm4, %v552_v35  ;;  %v719_v36 = vpop.permute.xlu1 %718 }
 0x298   : > { %1570 = vmatpush3.xpose.msk.msra.mxu0 %vm389_vm4, %v719_v36  ;;  %1571 = vmatprep.mubr.msk.f32.mxu0 %vm1770_vm1, %v1769_v8 }
 0x299   : > { %1579 = vmatprep.subr.mxu0 %v1769_v8 }
 0x29b   : > { %v717_v37 = vpop.permute.xlu1 %716 }
 0x29c   : > { %1572 = vmatmul.mubr.msk.f32.vlgmr.msra.gmra.mxu0 %vm389_vm4, %v717_v37 }
 0x29d   : > { %1581 = vmatprep.mubr.msk.f32.mxu0 %vm1770_vm1, %v1769_v8 }
 0x29f   : > { %v884_v38 = vpop.permute.xlu1 %883 }
 0x2a0   : > { %1580 = vmatpush3.xpose.msk.msra.mxu0 %vm389_vm4, %v884_v38 }
 0x2a1   : > { %1326 = vmatprep.subr.mxu0 %v1769_v8 }
 0x2a3   : > { %v882_v39 = vpop.permute.xlu1 %881 }
 0x2a4   : > { %1582 = vmatmul.mubr.msk.f32.vlgmr.msra.gmra.mxu0 %vm389_vm4, %v882_v39 }
 0x353   : > { %v460_v40 = vpop.f32.mrf.mxu1 }
 0x354   : > { %v464_v41 = vsel %vm389_vm4, %v460_v40, -inf }
 0x355   : > { %465 = vmax.xlane.f32.xlu1 %v464_v41  ;;  %v1553_v42 = vpop.f32.mrf.mxu1 }
 0x357   : > { %v625_v43 = vpop.f32.mrf.mxu0 }
 0x358   : > { %v629_v44 = vsel %vm389_vm4, %v625_v43, -inf }
 0x359   : > { %630 = vmax.xlane.f32.xlu0 %v629_v44  ;;  %v1563_v45 = vpop.f32.mrf.mxu0 }
 0x35c   : > { %v790_v46 = vpop.f32.mrf.mxu0 }
 0x35d   : > { %v794_v47 = vsel %vm389_vm4, %v790_v46, -inf }
 0x35e   : > { %v1573_v48 = vpop.f32.mrf.mxu0  ;;  %795 = vmax.xlane.f32.xlu1 %v794_v47 }
 0x364   : > { %v955_v49 = vpop.f32.mrf.mxu0 }
 0x365   : > { %v959_v50 = vsel %vm389_vm4, %v955_v49, -inf }
 0x366   : > { %960 = vmax.xlane.f32.xlu0 %v959_v50  ;;  %v1583_v51 = vpop.f32.mrf.mxu0 }
 0x36f   : > { %475 = vrot.lane.b32.xlu1 %v1922_v31, %s1778_s21 }
 0x3de   : > { %v466_v52 = vpop.xlane.xlu1 %465 }
 0x3df   : > { %v467_v53 = vsub.f32 %v460_v40, %v466_v52 }
 0x3e1   : > { %v468_v54 = vmul.f32 1.442695, %v467_v53 }
 0x3e2   : > { %v631_v55 = vpop.xlane.xlu0 %630 }
 0x3e3   : > { %1687 = vpow2.f32 %v468_v54  ;;  %v632_v56 = vsub.f32 %v625_v43, %v631_v55  ;;  %v1205_v55 = vld [vmem:[%s2216_s4 + $0x58] sm:$0xff] }
 0x3e5   : > { %v633_v57 = vmul.f32 1.442695, %v632_v56  ;;  %v1203_v56 = vld [vmem:[%s2216_s4 + $0x48] sm:$0xff] }
 0x3e7   : > { %1689 = vpow2.f32 %v633_v57  ;;  %v796_v58 = vpop.xlane.xlu1 %795  ;;  %v1202_v57 = vld [vmem:[%s2216_s4 + $0x40] sm:$0xff] }
 0x3e8   : > { %v797_v59 = vsub.f32 %v790_v46, %v796_v58  ;;  %v1201_v58 = vld [vmem:[%s2216_s4 + $0x38] sm:$0xff] }
 0x3ea   : > { %v798_v60 = vmul.f32 1.442695, %v797_v59  ;;  %v1200_v59 = vld [vmem:[%s2216_s4 + $0x30] sm:$0xff] }
 0x3eb   : > { %v476_v61 = vpop.permute.xlu1 %475 }
 0x3ec   : > { %1691 = vpow2.f32 %v798_v60  ;;  %1555 = vmatpush3.msra.mxu1 %v476_v61  ;;  %v1199_v60 = vld [vmem:[%s2216_s4 + $0x28] sm:$0xff]  ;;  %v1198_v61 = vld [vmem:[%s2216_s4 + $0x20] sm:$0xff] }
 0x3ed   : > { %1564 = vmatprep.subr.mxu1 %v1769_v8 }
 0x3ef   : > { %v961_v62 = vpop.xlane.xlu0 %960 }
 0x3f0   : > { %v1688_v63 = vpop.eup %1687  ;;  %v962_v1 = vsub.f32 %v955_v49, %v961_v62  ;;  %v1197_v62 = vld [vmem:[%s2216_s4 + $0x18] sm:$0xff] }
 0x3f1   : > { %v470_v2 = vsel %vm389_vm4, %v1688_v63, 0.0 }
 0x3f2   : > { %v963_v3 = vmul.f32 1.442695, %v962_v1  ;;  %471 = vadd.xlane.f32.xlu1 %v470_v2 }
 0x3f4   : > { %v1690_v4 = vpop.eup %1689  ;;  %1693 = vpow2.f32 %v963_v3 }
 0x3f5   : > { %v635_v5 = vsel %vm389_vm4, %v1690_v4, 0.0 }
 0x3f6   : > { %636 = vadd.xlane.f32.xlu0 %v635_v5 }
 0x3f9   : > { %v1692_v6 = vpop.eup %1691 }
 0x3fa   : > { %v800_v7 = vsel %vm389_vm4, %v1692_v6, 0.0 }
 0x3fb   : > { %801 = vadd.xlane.f32.xlu1 %v800_v7 }
 0x401   : > { %v1694_v9 = vpop.eup %1693 }
 0x402   : > { %v965_v10 = vsel %vm389_vm4, %v1694_v9, 0.0 }
 0x403   : > { %966 = vadd.xlane.f32.xlu0 %v965_v10  ;;  %v1153_v10 = vsub.s32 2, %v1908_v21 }
 0x40c   : > { %805 = vrot.lane.b32.xlu1 %v1922_v31, %s1779_s22  ;;  %s1784_s22 = smov 24  }
 0x410   : > { %970 = vrot.lane.b32.xlu1 %v1922_v31, %s1780_s23 }
 0x419   : > { %640 = vrot.lane.b32.xlu0 %v1922_v31, %s1781_s29  ;;  %v1064_v31 = vld [vmem:[%s2215_s3 + $0x8] sm:$0xff] }
 0x47b   : > { %v472_v11 = vpop.xlane.xlu1 %471 }
 0x47c   : > { %1695 = vrcp.f32 %v472_v11  ;;  %v1195_v11 = vld [vmem:[%s2216_s4 + $0x8] sm:$0xff] }
 0x47f   : > { %v637_v12 = vpop.xlane.xlu0 %636 }
 0x480   : > { %1697 = vrcp.f32 %v637_v12  ;;  %v1154_v12 = vrot.slane %v1914_v23, %v1153_v10 }
 0x484   : > { %v802_v13 = vpop.xlane.xlu1 %801 }
 0x485   : > { %1699 = vrcp.f32 %v802_v13  ;;  %v1168_v13 = vsub.s32 3, %v1908_v21 }
 0x488   : > { %v806_v18 = vpop.permute.xlu1 %805 }
 0x489   : > { %v1696_v14 = vpop.eup %1695 }
 0x48a   : > { %v474_v15 = vmul.f32 %v1696_v14, %v1688_v63  ;;  %v1196_v63 = vld [vmem:[%s2216_s4 + $0x10] sm:$0xff]  ;;  %v1194_v14 = vld [vmem:[%s2216_s4] sm:$0xff] }
 0x48c   : > { %v967_v16 = vpop.xlane.xlu0 %966  ;;  %1557 = vmatmul.mubr.msk.f32.vlgmr.msra.gmra.mxu1 %vm389_vm4, %v474_v15  ;;  %v971_v25 = vpop.permute.xlu1 %970 }
 0x48d   : > { %v1698_v17 = vpop.eup %1697  ;;  %1701 = vrcp.f32 %v967_v16  ;;  %1566 = vmatprep.mubr.msk.f32.mxu1 %vm1770_vm1, %v1769_v8  ;;  %v1169_v16 = vrot.slane %v1914_v23, %v1168_v13 }
 0x48e   : > { %v639_v20 = vmul.f32 %v1698_v17, %v1690_v4 }
 0x490   : > { %v641_v19 = vpop.permute.xlu0 %640 }
 0x491   : > { %1565 = vmatpush3.msra.mxu1 %v641_v19 }
 0x492   : > { %v1700_v22 = vpop.eup %1699  ;;  %1567 = vmatmul.mubr.msk.f32.vlgmr.msra.gmra.mxu1 %vm389_vm4, %v639_v20  ;;  %1574 = vmatprep.subr.mxu1 %v1769_v8 }
 0x493   : > { %1575 = vmatpush3.msra.mxu1 %v806_v18  ;;  %1576 = vmatprep.mubr.msk.f32.mxu1 %vm1770_vm1, %v1769_v8  ;;  %v804_v24 = vmul.f32 %v1700_v22, %v1692_v6 }
 0x494   : > { %1584 = vmatprep.subr.mxu1 %v1769_v8 }
 0x496   : > { %1577 = vmatmul.mubr.msk.f32.vlgmr.msra.gmra.mxu1 %vm389_vm4, %v804_v24  ;;  %v2064_v24 = vld [vmem:[%s2218_s6] ss:$0 sm:$0xff] }
 0x497   : > { %1585 = vmatpush3.msra.mxu1 %v971_v25  ;;  %1586 = vmatprep.mubr.msk.f32.mxu1 %vm1770_vm1, %v1769_v8 }
 0x498   : > { %1589 = vmatprep.subr.mxu1 %v1769_v8 }
 0x49a   : > { %v1702_v26 = vpop.eup %1701 }
 0x49b   : > { %v969_v27 = vmul.f32 %v1702_v26, %v1694_v9 }
 0x49d   : > { %1587 = vmatmul.mubr.msk.f32.vlgmr.msra.gmra.mxu1 %vm389_vm4, %v969_v27 }
 0x49e   : > { %1597 = vmatprep.mubr.msk.f32.mxu1 %vm1770_vm1, %v1769_v8  ;;  %1590 = vmatpush3.msra.mxu1 %v1066_v28 }
 0x49f   : > { %1591 = vmatprep.subr.mxu1 %v1769_v8 }
 0x4a0   : > { %1592 = vmatpush3.msra.mxu1 %v1065_v29 }
 0x4a1   : > { %1593 = vmatprep.subr.mxu1 %v1769_v8 }
 0x4a2   : > { %1594 = vmatpush3.msra.mxu1 %v1064_v31  ;;  %v1310_v31 = vld [vmem:[%s2217_s5 + $0x70] sm:$0xff] }
 0x4a3   : > { %1595 = vmatprep.subr.mxu1 %v1769_v8 }
 0x4a4   : > { %1596 = vmatpush3.msra.mxu1 %v1063_v33  ;;  %v1308_v33 = vld [vmem:[%s2217_s5 + $0x60] sm:$0xff] }
 0x4a5   : > { %1600 = vmatprep.subr.mxu1 %v1769_v8 }
 0x54c   : > { %v547_v30 = vpop.f32.mrf.mxu1 }
 0x54e   : > { %v1558_v32 = vpop.f32.mrf.mxu1 }
 0x54f   : > { %v1309_v32 = vld [vmem:[%s2217_s5 + $0x68] sm:$0xff] }
 0x552   : > { %v712_v34 = vpop.f32.mrf.mxu1 }
 0x553   : > { %1047 = vrot.lane.b32.xlu0 %v712_v34, %s1782_s19  ;;  %v1307_v34 = vld [vmem:[%s2217_s5 + $0x58] sm:$0xff]  ;;  %s267_s19 = sand.u32 1, %s1759_s25  }
 0x554   : > { %v1568_v35 = vpop.f32.mrf.mxu1  ;;  %s1400_s13 = scalar_lea.sflag [#allocation3], %s267_s19 }
 0x555   : > { %v1306_v35 = vld [vmem:[%s2217_s5 + $0x50] sm:$0xff] }
 0x556   : > { %v877_v36 = vpop.f32.mrf.mxu1 }
 0x557   : > { %1051 = vrot.lane.b32.xlu1 %v877_v36, %s1783_s20  ;;  %s1785_s20 = smov 32   ;;  %v1305_v36 = vld [vmem:[%s2217_s5 + $0x48] sm:$0xff] }
 0x558   : > { %v1578_v37 = vpop.f32.mrf.mxu1 }
 0x559   : > { %v1304_v37 = vld [vmem:[%s2217_s5 + $0x40] sm:$0xff] }
 0x55d   : > { %v1042_v38 = vpop.f32.mrf.mxu1 }
 0x55e   : > { %1055 = vrot.lane.b32.xlu0 %v1042_v38, %s1784_s22  ;;  %v1303_v38 = vld [vmem:[%s2217_s5 + $0x38] sm:$0xff] }
 0x55f   : > { %v1588_v39 = vpop.f32.mrf.mxu1 }
 0x560   : > { %v1302_v39 = vld [vmem:[%s2217_s5 + $0x30] sm:$0xff] }
 0x5c5   : > { %v1048_v40 = vpop.permute.xlu0 %1047 }
 0x5c6   : > { %v1058_v42 = vsel %vm389_vm4, %v547_v30, %v1048_v40  ;;  %v1311_v30 = vld [vmem:[%s2217_s5 + $0x78] sm:$0xff]  ;;  %v1301_v40 = vld [vmem:[%s2217_s5 + $0x28] sm:$0xff] }
 0x5c7   : > { %1327 = vmatpush1.msra.mxu0 %v1311_v30 }
 0x5c8   : > { %1328 = vmatprep.subr.mxu0 %v1769_v8 }
 0x5c9   : > { %v1052_v41 = vpop.permute.xlu1 %1051  ;;  %1329 = vmatpush1.msra.mxu0 %v1310_v31 }
 0x5ca   : > { %v1060_v43 = vsel %vm1059_vm5, %v1058_v42, %v1052_v41  ;;  %1330 = vmatprep.subr.mxu0 %v1769_v8  ;;  %v1300_v41 = vld [vmem:[%s2217_s5 + $0x20] sm:$0xff]  ;;  %v1299_v42 = vld [vmem:[%s2217_s5 + $0x18] sm:$0xff] }
 0x5cb   : > { %1331 = vmatpush1.msra.mxu0 %v1309_v32 }
 0x5cc   : > { %1332 = vmatprep.subr.mxu0 %v1769_v8 }
 0x5cd   : > { %1333 = vmatpush1.msra.mxu0 %v1308_v33 }
 0x5ce   : > { %1334 = vmatprep.subr.mxu0 %v1769_v8 }
 0x5cf   : > { %1335 = vmatpush1.msra.mxu0 %v1307_v34 }
 0x5d0   : > { %v1056_v44 = vpop.permute.xlu0 %1055  ;;  %1336 = vmatprep.subr.mxu0 %v1769_v8 }
 0x5d1   : > { %v1062_v45 = vsel %vm1061_vm6, %v1060_v43, %v1056_v44  ;;  %1337 = vmatpush1.msra.mxu0 %v1306_v35  ;;  %v1298_v43 = vld [vmem:[%s2217_s5 + $0x10] sm:$0xff]  ;;  %v1297_v44 = vld [vmem:[%s2217_s5 + $0x8] sm:$0xff] }
 0x5d2   : > { %1598 = vmatmul.mubr.msk.f32.vlgmr.msra.gmra.mxu1 %vm277_vm0, %v1062_v45  ;;  %1338 = vmatprep.subr.mxu0 %v1769_v8  ;;  %v1296_v45 = vld [vmem:[%s2217_s5] sm:$0xff] }
 0x5d3   : > { %1624 = vmatprep.mubr.msk.f32.mxu1 %vm1770_vm1, %v1769_v8  ;;  %1601 = vmatpush3.msra.mxu1 %v1205_v55 }
 0x5d4   : > { %1602 = vmatprep.subr.mxu1 %v1769_v8  ;;  %1339 = vmatpush1.msra.mxu0 %v1305_v36 }
 0x5d5   : > { %1340 = vmatprep.subr.mxu0 %v1769_v8 }
 0x5d6   : > { %1341 = vmatpush1.msra.mxu0 %v1304_v37 }
 0x5d7   : > { %1342 = vmatprep.subr.mxu0 %v1769_v8 }
 0x5d8   : > { %1343 = vmatpush1.msra.mxu0 %v1303_v38 }
 0x5d9   : > { %1344 = vmatprep.subr.mxu0 %v1769_v8 }
 0x5da   : > { %1345 = vmatpush1.msra.mxu0 %v1302_v39 }
 0x5db   : > { %1346 = vmatprep.subr.mxu0 %v1769_v8 }
 0x5dc   : > { %1347 = vmatpush1.msra.mxu0 %v1301_v40 }
 0x5dd   : > { %1348 = vmatprep.subr.mxu0 %v1769_v8 }
 0x5de   : > { %1349 = vmatpush1.msra.mxu0 %v1300_v41 }
 0x5df   : > { %1350 = vmatprep.subr.mxu0 %v1769_v8 }
 0x5e0   : > { %1351 = vmatpush1.msra.mxu0 %v1299_v42 }
 0x5e1   : > { %1352 = vmatprep.subr.mxu0 %v1769_v8 }
 0x5e2   : > { %1353 = vmatpush1.msra.mxu0 %v1298_v43 }
 0x5e3   : > { %1354 = vmatprep.subr.mxu0 %v1769_v8 }
 0x5e4   : > { %1355 = vmatpush1.msra.mxu0 %v1297_v44 }
 0x5e5   : > { %1356 = vmatprep.subr.mxu0 %v1769_v8 }
 0x5e6   : > { %1357 = vmatpush1.msra.mxu0 %v1296_v45 }
 0x5e7   : > { %1374 = vmatprep.subr.mxu0 %v1769_v8 }
 0x692   : > { %v1136_v46 = vpop.f32.mrf.mxu1 }
 0x693   : > { %v2000_v47 = vadd.f32 %v1136_v46, %v1880_v0  ;;  %v1204_v0 = vld [vmem:[%s2216_s4 + $0x50] sm:$0xff]  ;;  %v1319_v46 = vld [vmem:[%s2217_s5 + $0xb8] sm:$0xff] }
 0x694   : > { %v1599_v48 = vpop.f32.mrf.mxu1  ;;  %1603 = vmatpush3.msra.mxu1 %v1204_v0  ;;  %1375 = vmatpush2.msra.mxu0 %v1319_v46 }
 0x695   : > { %v1141_v49 = vsel %vm277_vm0, %v2000_v47, 0.0  ;;  %1604 = vmatprep.subr.mxu1 %v1769_v8  ;;  %v1318_v48 = vld [vmem:[%s2217_s5 + $0xb0] sm:$0xff]  ;;  %1376 = vmatprep.subr.mxu0 %v1769_v8 }
 0x696   : > { %1142 = vadd.xlane.f32.xlu1 %v1141_v49  ;;  %1605 = vmatpush3.msra.mxu1 %v1203_v56  ;;  %v1317_v49 = vld [vmem:[%s2217_s5 + $0xa8] sm:$0xff] }
 0x697   : > { %1606 = vmatprep.subr.mxu1 %v1769_v8  ;;  %1377 = vmatpush2.msra.mxu0 %v1318_v48 }
 0x698   : > { %1607 = vmatpush3.msra.mxu1 %v1202_v57  ;;  %1378 = vmatprep.subr.mxu0 %v1769_v8 }
 0x699   : > { %1608 = vmatprep.subr.mxu1 %v1769_v8  ;;  %1379 = vmatpush2.msra.mxu0 %v1317_v49 }
 0x69a   : > { %1609 = vmatpush3.msra.mxu1 %v1201_v58  ;;  %1380 = vmatprep.subr.mxu0 %v1769_v8 }
 0x69b   : > { %1610 = vmatprep.subr.mxu1 %v1769_v8 }
 0x69c   : > { %1611 = vmatpush3.msra.mxu1 %v1200_v59 }
 0x69d   : > { %1612 = vmatprep.subr.mxu1 %v1769_v8 }
 0x69e   : > { %1613 = vmatpush3.msra.mxu1 %v1199_v60 }
 0x69f   : > { %1614 = vmatprep.subr.mxu1 %v1769_v8 }
 0x6a0   : > { %1615 = vmatpush3.msra.mxu1 %v1198_v61 }
 0x6a1   : > { %1616 = vmatprep.subr.mxu1 %v1769_v8 }
 0x6a2   : > { %1617 = vmatpush3.msra.mxu1 %v1197_v62 }
 0x6a3   : > { %1618 = vmatprep.subr.mxu1 %v1769_v8 }
 0x6a4   : > { %1619 = vmatpush3.msra.mxu1 %v1196_v63 }
 0x6a5   : > { %1620 = vmatprep.subr.mxu1 %v1769_v8 }
 0x6a6   : > { %1621 = vmatpush3.msra.mxu1 %v1195_v11 }
 0x6a7   : > { %1622 = vmatprep.subr.mxu1 %v1769_v8 }
 0x6a8   : > { %1623 = vmatpush3.msra.mxu1 %v1194_v14 }
 0x71f   : > { %v1143_v50 = vpop.xlane.xlu1 %1142 }
 0x720   : > { %v1144_v51 = vmul.f32 0.03125, %v1143_v50  ;;  %v1316_v50 = vld [vmem:[%s2217_s5 + $0xa0] sm:$0xff] }
 0x721   : > { %1381 = vmatpush2.msra.mxu0 %v1316_v50 }
 0x722   : > { %v1145_v52 = vsub.f32 %v2000_v47, %v1144_v51  ;;  %v1315_v51 = vld [vmem:[%s2217_s5 + $0x98] sm:$0xff]  ;;  %1382 = vmatprep.subr.mxu0 %v1769_v8 }
 0x723   : > { %1383 = vmatpush2.msra.mxu0 %v1315_v51 }
 0x724   : > { %v1146_v53 = vmul.f32 %v1145_v52, %v1145_v52  ;;  %v1155_v15 = vmul.f32 %v1154_v12, %v1145_v52  ;;  %v1314_v52 = vld [vmem:[%s2217_s5 + $0x90] sm:$0xff]  ;;  %1384 = vmatprep.subr.mxu0 %v1769_v8 }
 0x725   : > { %1385 = vmatpush2.msra.mxu0 %v1314_v52 }
 0x726   : > { %v1147_v54 = vsel %vm277_vm0, %v1146_v53, 0.0  ;;  %v1313_v53 = vld [vmem:[%s2217_s5 + $0x88] sm:$0xff]  ;;  %1386 = vmatprep.subr.mxu0 %v1769_v8 }
 0x727   : > { %1148 = vadd.xlane.f32.xlu0 %v1147_v54  ;;  %1387 = vmatpush2.msra.mxu0 %v1313_v53  ;;  %v1312_v54 = vld [vmem:[%s2217_s5 + $0x80] sm:$0xff] }
 0x728   : > { %1388 = vmatprep.subr.mxu0 %v1769_v8 }
 0x729   : > { %1389 = vmatpush2.msra.mxu0 %v1312_v54 }
 0x7b0   : > { %v1149_v1 = vpop.xlane.xlu0 %1148 }
 0x7b1   : > { %v1150_v2 = vmul.f32 0.032258064, %v1149_v1 }
 0x7b3   : > { %1703 = vrsqrt.f32 %v1150_v2  ;;  %vm1158_vm7 = vcmp.eq.f32.partialorder %v1150_v2, inf  ;;  %v1161_v5 = vand.u32 2147483648, %v1150_v2  ;;  %vm1160_vm8 = vcmp.eq.f32.partialorder %v1150_v2, 0.0 }
 0x7c0   : > { %v1704_v3 = vpop.eup %1703 }
 0x7c1   : > { %v1157_v4 = vmul.f32 %v1704_v3, %v1150_v2 }
 0x7c3   : > { %v1159_v6 = vsel %vm1158_vm7, %v1150_v2, %v1157_v4 }
 0x7c4   : > { %v1162_v7 = vsel %vm1160_vm8, %v1161_v5, %v1159_v6 }
 0x7c5   : > { %v1163_v9 = vadd.f32 1e-06, %v1162_v7 }
 0x7c7   : > { %1705 = vrcp.f32 %v1163_v9 }
 0x7d4   : > { %v1706_v17 = vpop.eup %1705 }
 0x7d5   : > { %v1165_v18 = vmul.f32 %v1706_v17, %v1155_v15 }
 0x7d7   : > { %v1170_v19 = vadd.f32 %v1169_v16, %v1165_v18 }
 0x7d9   : > { %1184 = vrot.lane.b32.xlu0 %v1170_v19, %s1785_s20  ;;  %v1179_v20 = vrot.slane %v1170_v19, 1  ;;  %v1175_v23 = vrot.slane %v1170_v19, 7  ;;  %s1476_s20 = sshll.u32 %s267_s19, 3 }
 0x7da   : > { %s269_s22 = scalar_lea.vmem [#allocation2], %s1476_s20 }
 0x7db   : > { %v1182_v22 = vsel %vm1174_vm9, 0.0, %v1179_v20  ;;  %v1178_v26 = vsel %vm1173_vm10, 0.0, %v1175_v23  ;;  %s1413_s23 = sshll.u32 %s269_s22, 4  ;;  %s1414_s23 = int_to_ptr.vmem [resolvable:$true] %s1413_s23 }
 0x7dc   : > { %1188 = vrot.lane.b32.xlu1 %v1182_v22, %s1778_s21  ;;  %s1707_s14 = scalar_lea.vmem %s1414_s23, 128 }
 0x7dd   : > { %1320 = vrot.lane.b32.xlu0 %v2064_v24, %s1778_s21  ;;  %p1708_p11 = scmp.ne.s32.totalorder %s1414_s23, %s1707_s14 }
 0x7df   : > { %p1709_p12 = pnand %p1708_p11, %p1865_p5 }
 0x7e1   : > { %p1710_p13 = pneg %p1709_p12 }
 0x84b   : > { %v1185_v25 = vpop.permute.xlu0 %1184 }
 0x84c   : > { %v1191_v27 = vsel %vm277_vm0, %v1178_v26, %v1185_v25 }
 0x84e   : > { %v1189_v28 = vpop.permute.xlu1 %1188 }
 0x84f   : > { %v1193_v29 = vsel %vm1192_vm11, %v1191_v27, %v1189_v28  ;;  %v1321_v63 = vpop.permute.xlu0 %1320 }
 0x850   : > { %1625 = vmatmul.mubr.msk.f32.vlgmr.msra.gmra.mxu1 %vm1212_vm12, %v1193_v29 }
 0x910   : > { %v1282_v55 = vpop.f32.mrf.mxu1 }
 0x911   : > { %v1283_v0 = vadd.f32 %v2064_v24, %v1282_v55 }
 0x912   : > { %v1626_v56 = vpop.f32.mrf.mxu1 }
 0x913   : > { %v1286_v57 = vmax.f32 %v1283_v0, 0.0 }
 0x915   : > { %1292 = vrot.lane.b32.xlu1 %v1286_v57, %s1778_s21  ;;  %v1289_v58 = vrot.slane %v1286_v57, 1  ;;  %v1287_v8 = vrot.slane %v1286_v57, 7  ;;  %s1496_s21 = sshll.u32 %s1848_s28, 7  ;;  %s1711_s28 = sshll.u32 %s1786_s15, 4  ;;  %s1712_s28 = int_to_ptr.vmem [resolvable:$false] %s1711_s28 }
 0x916   : > { %s1411_s9 = scalar_lea.hbm %s2219_s7, %s1496_s21  ;;  %s1713_s16 = scalar_lea.vmem %s1712_s28, 256 }
 0x917   : > { %v1290_v59 = vsel %vm1174_vm9, 0.0, %v1289_v58  ;;  %v1288_v61 = vsel %vm1173_vm10, 0.0, %v1287_v8  ;;  %p1714_p0 = scmp.lt.s32.totalorder %s1414_s23, %s1712_s28  ;;  %p1715_p1 = scmp.lt.s32.totalorder %s1713_s16, %s1707_s14 }
 0x918   : > { %1494 = vmatprep.mubr.msk.f32.mxu0 %vm1192_vm11, %v1290_v59 }
 0x919   : > { %p1716_p2 = por %p1715_p1, %p1714_p0 }
 0x91b   : > { %p1717_p3 = pnand %p1716_p2, %p1710_p13 }
 0x987   : > { %v1293_v60 = vpop.permute.xlu1 %1292 }
 0x988   : > { %v1295_v62 = vsel %vm1192_vm11, %v1288_v61, %v1293_v60 }
 0x989   : > { %1391 = vmatmul.mubr.f32.vlgmr.msra.gmra.mxu0 %v1295_v62 }
 0xa49   : > { %v1392_v1 = vpop.f32.mrf.mxu0 }
 0xa4a   : > { %v1393_v2 = vadd.f32 %v1392_v1, %v1321_v63 }
 0xa4b   : > { %v1394_v3 = vpop.f32.mrf.mxu0 }
 0xa4c   : > { %v1396_v4 = vmax.f32 %v1393_v2, 0.0 }
 0xa4e   : > { %v1397_v5 = vadd.f32 %v1396_v4, %v2000_v47 }
 0xa50   : > { %1398 = vst.msk [vmem:[%s269_s22] sm:$0xff] %vm277_vm0, %v1397_v5 }
 0xa51   : > { %1720 = shalt.err (!%p1717_p3)
}
 0xa52   : > { %s1721_s17 = scalar_lea.hbm %s1411_s9, 128  ;;  %s1725_s20 = scalar_lea.hbm %s2219_s7, 256 }
 0xa53   : > { %p1722_p4 = scmp.ne.s32.totalorder %s1411_s9, %s1721_s17  ;;  %p1726_p9 = scmp.lt.s32.totalorder %s1411_s9, %s2219_s7 }
 0xa54   : > { %p1727_p10 = scmp.lt.s32.totalorder %s1725_s20, %s1721_s17 }
 0xa55   : > { %p1723_p7 = pnand %p1722_p4, %p1865_p5 }
 0xa56   : > { %p1728_p11 = por %p1727_p10, %p1726_p9 }
 0xa57   : > { %p1724_p8 = pneg %p1723_p7 }
 0xa59   : > { %p1729_p12 = pnand %p1728_p11, %p1724_p8 }
 0xa5b   : > { %1732 = shalt.err (!%p1729_p12)
}
 0xa5c   : > { %1627 = dma.vmem_to_hbm [thread:$0]  (%p1865_p5), %s1414_s23, 128, %s1411_s9, %s1400_s13  }
 0xa5d PF: > { %p1633_p13 = scmp.ge.s32.totalorder %s1767_s27, 2  ;;  %s1425_s29 = sand.u32 1, %s1755_s24  }
 0xa5e   : > { %s1426_s8 = scalar_lea.sflag [#allocation3], %s1425_s29 }
 0xa5f   : > { %p1630_p0 = pnand %p1633_p13, %p1869_p6 }
 0xa61   : > { %p1631_p1 = pneg %p1630_p0 }
 0xa63   : > { %1750 = dma.done.wait (%p1631_p1), %s1426_s8, 128  }
 0xa64   : > { %1752 = vsyncadd (%p1631_p1), %s1426_s8, 4294967168  ;;  %p17_p2 = scmp.ge.s32.totalorder %s1852_s30, 4   ;;  %s2222_s24 = smov %s1759_s25 }
 0xa65   : > { %s2223_s25 = smov %s1763_s26  ;;  %s2224_s26 = smov %s1863_s10 }
 0xa66   : > { %s2225_s27 = smov %s1852_s30  ;;  %19 = sbr.rel (!%p17_p2) target bundleno = 3 (0x3), region = 83 }
 0xa6b   :  { %1431 = vsyncpa [#allocation3], 1 }
 0xa6c   :  { %1433 = vsyncpa [#allocation3 + $0x1], 1 }

</bundles_post_ra>
